<compile_context>
chip_gen: v7x
topology: tpu7x:2x2x1
jax: 0.10.0
libtpu: 0.0.40
codegen_flags: <defaults>
</compile_context>

<pallas_src>
import jax
import jax.numpy as jnp
from jax import lax
from jax.experimental import pallas as pl
from jax.experimental.pallas import tpu as pltpu


def decoder_kernel(z_ref,
                   w1_ref, b1_ref,
                   w2_ref, b2_ref,
                   w3_ref, b3_ref,
                   w4_ref, b4_ref,
                   out_ref):
    # z arrives in its natural (TILE_B, latent) layout; the transpose is folded
    # into the first matmul via the transpose_rhs ("q @ k.T") MXU path:
    #   h1 = W1 @ z.T  -> (16, TILE_B), batch on lanes from here on.
    z = z_ref[...]                                                     # (TB, latent)
    h = lax.dot_general(w1_ref[...], z, (((1,), (1,)), ((), ())),
                        preferred_element_type=jnp.float32) + b1_ref[...]
    h = jnp.maximum(h, 0.0)                                            # (16, TB)

    h = jnp.dot(w2_ref[...], h, preferred_element_type=jnp.float32) + b2_ref[...]
    h = jnp.maximum(h, 0.0)                                            # (16, TB)

    h = jnp.dot(w3_ref[...], h, preferred_element_type=jnp.float32) + b3_ref[...]
    h = jnp.maximum(h, 0.0)                                            # (32, TB)

    logits = jnp.dot(w4_ref[...], h, preferred_element_type=jnp.float32) + b4_ref[...]
    # Sigmoid epilogue: exp on the EUP + exact reciprocal, lane-dense store.
    out_ref[...] = pl.reciprocal(1.0 + jnp.exp(-logits))               # (64, TB)


def _pick_tile_b(B):
    """Largest lane-aligned tile (multiple of 128) dividing B that still
    yields a grid of >= 2 steps (pipelining + v7x dual-TC sharding)."""
    for t in (4096, 2048, 1024, 512, 256, 128):
        if B % t == 0 and B // t >= 2:
            return t
    return B  # tiny / unaligned batch: single full block fallback


def decoder_forward(z, params, *, tile_b=None):
    B, latent = z.shape
    (w1, b1), (w2, b2), (w3, b3), (w4, b4) = params
    out_dim = w4.shape[0]

    if tile_b is None:
        tile_b = _pick_tile_b(B)
    assert B % tile_b == 0
    # tile_b must be lane-aligned (multiple of 128) or equal the full batch.
    assert tile_b % 128 == 0 or tile_b == B

    def const_spec(shape):
        # Same full block at every grid step (weights / biases, ~12 KB total).
        return pl.BlockSpec(shape, lambda i: (0, 0))

    grid = (B // tile_b,)
    outT = pl.pallas_call(
        decoder_kernel,
        out_shape=jax.ShapeDtypeStruct((out_dim, B), jnp.float32),
        grid_spec=pltpu.PrefetchScalarGridSpec(
            num_scalar_prefetch=0,
            grid=grid,
            in_specs=[
                pl.BlockSpec((tile_b, latent), lambda i: (i, 0)),
                const_spec(w1.shape), const_spec(b1.shape),
                const_spec(w2.shape), const_spec(b2.shape),
                const_spec(w3.shape), const_spec(b3.shape),
                const_spec(w4.shape), const_spec(b4.shape),
            ],
            out_specs=pl.BlockSpec((out_dim, tile_b), lambda i: (0, i)),
        ),
        compiler_params=pltpu.CompilerParams(
            dimension_semantics=("parallel",)),
    )(z, w1, b1, w2, b2, w3, b3, w4, b4)

    return outT.T  # back to the PyTorch-facing (B, 64) layout


def init_params(key, latent_dims):
    # Deterministic synthetic init (PyTorch-like uniform fan-in scaling).
    # Weights stored in PyTorch nn.Linear layout: (out_features, in_features);
    # biases as (out_features, 1) column vectors for lane-broadcast in-kernel.
    dims = [(latent_dims, 16), (16, 16), (16, 32), (32, 64)]
    params = []
    for fan_in, fan_out in dims:
        key, kw, kb = jax.random.split(key, 3)
        bound = 1.0 / jnp.sqrt(fan_in)
        w = jax.random.uniform(kw, (fan_out, fan_in), jnp.float32, -bound, bound)
        b = jax.random.uniform(kb, (fan_out, 1), jnp.float32, -bound, bound)
        params.append((w, b))
    return params


def decoder_reference(z, params):
    h = z
    for i, (w, b) in enumerate(params):
        h = h @ w.T + b[:, 0]
        h = jax.nn.relu(h) if i < 3 else jax.nn.sigmoid(h)
    return h


if __name__ == "__main__":
    key = jax.random.PRNGKey(0)
    latent_dims = 8

    # Main case: lane-aligned batch -> tile_b=256, grid=(2,) (pipelined,
    # dual-TC shardable on v7x).
    B = 512
    kz, kp = jax.random.split(key)
    z = jax.random.normal(kz, (B, latent_dims), jnp.float32)
    params = init_params(kp, latent_dims)

    out = decoder_forward(z, params)
    out = jax.block_until_ready(out)
    ref = decoder_reference(z, params)
    assert out.shape == (B, 64), out.shape
    assert jnp.allclose(out, ref, atol=1e-5, rtol=1e-5), float(
        jnp.max(jnp.abs(out - ref)))

    # Fallback case: tiny batch (single full block, tile_b = B).
    z_small = jax.random.normal(jax.random.PRNGKey(1), (8, latent_dims),
                                jnp.float32)
    out_small = jax.block_until_ready(decoder_forward(z_small, params))
    ref_small = decoder_reference(z_small, params)
    assert out_small.shape == (8, 64), out_small.shape
    assert jnp.allclose(out_small, ref_small, atol=1e-5, rtol=1e-5), float(
        jnp.max(jnp.abs(out_small - ref_small)))

    print("KERNEL_OK")
</pallas_src>

<mosaic_0001>
module attributes {stable_mosaic.version = 11 : i64} {
  func.func @decoder_kernel(%arg0: i32, %arg1: memref<256x8xf32, #tpu.memory_space<vmem>>, %arg2: memref<16x8xf32, #tpu.memory_space<vmem>>, %arg3: memref<16x1xf32, #tpu.memory_space<vmem>>, %arg4: memref<16x16xf32, #tpu.memory_space<vmem>>, %arg5: memref<16x1xf32, #tpu.memory_space<vmem>>, %arg6: memref<32x16xf32, #tpu.memory_space<vmem>>, %arg7: memref<32x1xf32, #tpu.memory_space<vmem>>, %arg8: memref<64x32xf32, #tpu.memory_space<vmem>>, %arg9: memref<64x1xf32, #tpu.memory_space<vmem>>, %arg10: memref<64x256xf32, #tpu.memory_space<vmem>>) attributes {dimension_semantics = [#tpu.dimension_semantics<parallel>], iteration_bounds = array<i64: 2>, scalar_prefetch = 0 : i64, scratch_operands = 0 : i64, tpu.core_type = #tpu.core_type<tc>, window_params = [{transform_indices = @transform_0, window_bounds = array<i64: 256, 8>}, {pipeline_mode = #tpu.pipeline_mode<synchronous>, transform_indices = @transform_1, window_bounds = array<i64: 16, 8>}, {pipeline_mode = #tpu.pipeline_mode<synchronous>, transform_indices = @transform_2, window_bounds = array<i64: 16, 1>}, {pipeline_mode = #tpu.pipeline_mode<synchronous>, transform_indices = @transform_3, window_bounds = array<i64: 16, 16>}, {pipeline_mode = #tpu.pipeline_mode<synchronous>, transform_indices = @transform_4, window_bounds = array<i64: 16, 1>}, {pipeline_mode = #tpu.pipeline_mode<synchronous>, transform_indices = @transform_5, window_bounds = array<i64: 32, 16>}, {pipeline_mode = #tpu.pipeline_mode<synchronous>, transform_indices = @transform_6, window_bounds = array<i64: 32, 1>}, {pipeline_mode = #tpu.pipeline_mode<synchronous>, transform_indices = @transform_7, window_bounds = array<i64: 64, 32>}, {pipeline_mode = #tpu.pipeline_mode<synchronous>, transform_indices = @transform_8, window_bounds = array<i64: 64, 1>}, {transform_indices = @transform_9, window_bounds = array<i64: 64, 256>}]} {
    %c0 = arith.constant 0 : index
    %c0_0 = arith.constant 0 : index
    %0 = vector.load %arg1[%c0, %c0_0] : memref<256x8xf32, #tpu.memory_space<vmem>>, vector<256x8xf32>
    %c0_1 = arith.constant 0 : index
    %c0_2 = arith.constant 0 : index
    %1 = vector.load %arg2[%c0_1, %c0_2] : memref<16x8xf32, #tpu.memory_space<vmem>>, vector<16x8xf32>
    %cst = arith.constant dense<0.000000e+00> : vector<16x256xf32>
    %2 = tpu.matmul %1, %0, %cst {dimension_numbers = #tpu.dot_dimension_numbers<[1], [1], [0], [0], [0, 0, 1, 0], [], []>} : vector<16x8xf32>, vector<256x8xf32>, vector<16x256xf32> -> vector<16x256xf32>
    %c0_3 = arith.constant 0 : index
    %c0_4 = arith.constant 0 : index
    %3 = vector.load %arg3[%c0_3, %c0_4] : memref<16x1xf32, #tpu.memory_space<vmem>>, vector<16x1xf32>
    %4 = vector.broadcast %3 : vector<16x1xf32> to vector<16x256xf32>
    %5 = arith.addf %2, %4 : vector<16x256xf32>
    %cst_5 = arith.constant 0.000000e+00 : f32
    %6 = vector.broadcast %cst_5 : f32 to vector<16x256xf32>
    %7 = arith.maximumf %5, %6 : vector<16x256xf32>
    %c0_6 = arith.constant 0 : index
    %c0_7 = arith.constant 0 : index
    %8 = vector.load %arg4[%c0_6, %c0_7] : memref<16x16xf32, #tpu.memory_space<vmem>>, vector<16x16xf32>
    %cst_8 = arith.constant dense<0.000000e+00> : vector<16x256xf32>
    %9 = tpu.matmul %8, %7, %cst_8 {dimension_numbers = #tpu.dot_dimension_numbers<[1], [0], [0], [1], [0, 0, 1, 1], [], []>} : vector<16x16xf32>, vector<16x256xf32>, vector<16x256xf32> -> vector<16x256xf32>
    %c0_9 = arith.constant 0 : index
    %c0_10 = arith.constant 0 : index
    %10 = vector.load %arg5[%c0_9, %c0_10] : memref<16x1xf32, #tpu.memory_space<vmem>>, vector<16x1xf32>
    %11 = vector.broadcast %10 : vector<16x1xf32> to vector<16x256xf32>
    %12 = arith.addf %9, %11 : vector<16x256xf32>
    %cst_11 = arith.constant 0.000000e+00 : f32
    %13 = vector.broadcast %cst_11 : f32 to vector<16x256xf32>
    %14 = arith.maximumf %12, %13 : vector<16x256xf32>
    %c0_12 = arith.constant 0 : index
    %c0_13 = arith.constant 0 : index
    %15 = vector.load %arg6[%c0_12, %c0_13] : memref<32x16xf32, #tpu.memory_space<vmem>>, vector<32x16xf32>
    %cst_14 = arith.constant dense<0.000000e+00> : vector<32x256xf32>
    %16 = tpu.matmul %15, %14, %cst_14 {dimension_numbers = #tpu.dot_dimension_numbers<[1], [0], [0], [1], [0, 0, 1, 1], [], []>} : vector<32x16xf32>, vector<16x256xf32>, vector<32x256xf32> -> vector<32x256xf32>
    %c0_15 = arith.constant 0 : index
    %c0_16 = arith.constant 0 : index
    %17 = vector.load %arg7[%c0_15, %c0_16] : memref<32x1xf32, #tpu.memory_space<vmem>>, vector<32x1xf32>
    %18 = vector.broadcast %17 : vector<32x1xf32> to vector<32x256xf32>
    %19 = arith.addf %16, %18 : vector<32x256xf32>
    %cst_17 = arith.constant 0.000000e+00 : f32
    %20 = vector.broadcast %cst_17 : f32 to vector<32x256xf32>
    %21 = arith.maximumf %19, %20 : vector<32x256xf32>
    %c0_18 = arith.constant 0 : index
    %c0_19 = arith.constant 0 : index
    %22 = vector.load %arg8[%c0_18, %c0_19] : memref<64x32xf32, #tpu.memory_space<vmem>>, vector<64x32xf32>
    %cst_20 = arith.constant dense<0.000000e+00> : vector<64x256xf32>
    %23 = tpu.matmul %22, %21, %cst_20 {dimension_numbers = #tpu.dot_dimension_numbers<[1], [0], [0], [1], [0, 0, 1, 1], [], []>} : vector<64x32xf32>, vector<32x256xf32>, vector<64x256xf32> -> vector<64x256xf32>
    %c0_21 = arith.constant 0 : index
    %c0_22 = arith.constant 0 : index
    %24 = vector.load %arg9[%c0_21, %c0_22] : memref<64x1xf32, #tpu.memory_space<vmem>>, vector<64x1xf32>
    %25 = vector.broadcast %24 : vector<64x1xf32> to vector<64x256xf32>
    %26 = arith.addf %23, %25 : vector<64x256xf32>
    %cst_23 = arith.constant 0.000000e+00 : f32
    %27 = vector.broadcast %cst_23 : f32 to vector<64x256xf32>
    %28 = arith.subf %27, %26 : vector<64x256xf32>
    %29 = math.exp %28 : vector<64x256xf32>
    %cst_24 = arith.constant 1.000000e+00 : f32
    %30 = vector.broadcast %cst_24 : f32 to vector<64x256xf32>
    %31 = arith.addf %30, %29 : vector<64x256xf32>
    %32 = tpu.reciprocal %31 : vector<64x256xf32> -> vector<64x256xf32>
    %c0_25 = arith.constant 0 : index
    %c0_26 = arith.constant 0 : index
    %33 = vector.load %arg10[%c0_25, %c0_26] : memref<64x256xf32, #tpu.memory_space<vmem>>, vector<64x256xf32>
    tpu.vector_store %arg10[%c0_25, %c0_26], %32 {strides = array<i32>} : memref<64x256xf32, #tpu.memory_space<vmem>>, vector<64x256xf32>,
    return
  }
  func.func @transform_0(%arg0: i32) -> (i32, i32) {
    %c0_i32 = arith.constant 0 : i32
    %c0_i32_0 = arith.constant 0 : i32
    return %arg0, %c0_i32 : i32, i32
  }
  func.func @transform_1(%arg0: i32) -> (i32, i32) {
    %c0_i32 = arith.constant 0 : i32
    %c0_i32_0 = arith.constant 0 : i32
    %c0_i32_1 = arith.constant 0 : i32
    return %c0_i32, %c0_i32_0 : i32, i32
  }
  func.func @transform_2(%arg0: i32) -> (i32, i32) {
    %c0_i32 = arith.constant 0 : i32
    %c0_i32_0 = arith.constant 0 : i32
    %c0_i32_1 = arith.constant 0 : i32
    return %c0_i32, %c0_i32_0 : i32, i32
  }
  func.func @transform_3(%arg0: i32) -> (i32, i32) {
    %c0_i32 = arith.constant 0 : i32
    %c0_i32_0 = arith.constant 0 : i32
    %c0_i32_1 = arith.constant 0 : i32
    return %c0_i32, %c0_i32_0 : i32, i32
  }
  func.func @transform_4(%arg0: i32) -> (i32, i32) {
    %c0_i32 = arith.constant 0 : i32
    %c0_i32_0 = arith.constant 0 : i32
    %c0_i32_1 = arith.constant 0 : i32
    return %c0_i32, %c0_i32_0 : i32, i32
  }
  func.func @transform_5(%arg0: i32) -> (i32, i32) {
    %c0_i32 = arith.constant 0 : i32
    %c0_i32_0 = arith.constant 0 : i32
    %c0_i32_1 = arith.constant 0 : i32
    return %c0_i32, %c0_i32_0 : i32, i32
  }
  func.func @transform_6(%arg0: i32) -> (i32, i32) {
    %c0_i32 = arith.constant 0 : i32
    %c0_i32_0 = arith.constant 0 : i32
    %c0_i32_1 = arith.constant 0 : i32
    return %c0_i32, %c0_i32_0 : i32, i32
  }
  func.func @transform_7(%arg0: i32) -> (i32, i32) {
    %c0_i32 = arith.constant 0 : i32
    %c0_i32_0 = arith.constant 0 : i32
    %c0_i32_1 = arith.constant 0 : i32
    return %c0_i32, %c0_i32_0 : i32, i32
  }
  func.func @transform_8(%arg0: i32) -> (i32, i32) {
    %c0_i32 = arith.constant 0 : i32
    %c0_i32_0 = arith.constant 0 : i32
    %c0_i32_1 = arith.constant 0 : i32
    return %c0_i32, %c0_i32_0 : i32, i32
  }
  func.func @transform_9(%arg0: i32) -> (i32, i32) {
    %c0_i32 = arith.constant 0 : i32
    %c0_i32_0 = arith.constant 0 : i32
    return %c0_i32, %arg0 : i32, i32
  }
}

</mosaic_0001>

<bundles_post_ra>
// kernel: tpu_custom_call.1
= control target key start
LH: loop header
LB: loop body
LE: loop exit
PB: predicated region body
PF: predicated region fallthrough
CT: control target
= control target key end

     0   :  { %14 = vsyncpa [#allocation3], 0  ;;  %s1889_s0 = inlined_call_operand.vmem [shape: f32[512,8], index: 0, kind: input, shape index: {}]   ;;  %s1890_s1 = inlined_call_operand.vmem [shape: f32[16,8], index: 1, kind: input, shape index: {}]   ;;  %s1891_s2 = inlined_call_operand.vmem [shape: f32[16,1], index: 2, kind: input, shape index: {}]   ;;  %s1892_s3 = inlined_call_operand.vmem [shape: f32[16,16], index: 3, kind: input, shape index: {}]   ;;  %s1893_s4 = inlined_call_operand.vmem [shape: f32[16,1], index: 4, kind: input, shape index: {}]   ;;  %s1894_s5 = inlined_call_operand.vmem [shape: f32[32,16], index: 5, kind: input, shape index: {}]   ;;  %s1895_s6 = inlined_call_operand.vmem [shape: f32[32,1], index: 6, kind: input, shape index: {}]   ;;  %s1896_s7 = inlined_call_operand.vmem [shape: f32[64,32], index: 7, kind: input, shape index: {}]   ;;  %s1897_s8 = inlined_call_operand.vmem [shape: f32[64,1], index: 8, kind: input, shape index: {}]   ;;  %s1898_s9 = inlined_call_operand.hbm [shape: f32[64,512], index: 9, kind: output, shape index: {}]  }
   0x1   :  { %16 = vsyncpa [#allocation3 + $0x1], 0  ;;  %s1560_s30 = smov 0   ;;  %s1562_s10 = smov 0  }
   0x2   :  { %s1564_s11 = smov 0   ;;  %s1566_s12 = smov 0  }
   0x3 LB: > { %s1581_s13 = sadd.s32 4294967295, %s1502_s12   ;;  %s1169_s14 = sadd.s32 4294967294, %s1502_s12   ;;  %s1502_s12 = sphi %s1566_s12, %s1906_s12   ;;  %s1498_s11 = sphi %s1564_s11, %s1905_s11   ;;  %s1494_s10 = sphi %s1562_s10, %s1904_s10   ;;  %s1490_s30 = sphi %s1560_s30, %s1903_s30  }
   0x4   : > { %s1585_s15 = sadd.s32 1, %s1502_s12   ;;  %s223_s16 = sadd.s32 1, %s1498_s11 }
   0x5   : > { %s220_s17 = ssub.s32 %s1502_s12, %s1585_s15  ;;  %p233_p0 = scmp.ne.s32.totalorder %s1498_s11, %s1494_s10 }
   0x6   : > { %p221_p1 = scmp.eq.s32.totalorder %s220_s17, 0  ;;  %p234_p2 = scmp.eq.s32.totalorder %s1581_s13, 1 }
   0x7   : > { %p239_p3 = scmp.ne.s32.totalorder %s1494_s10, %s1490_s30  ;;  %p240_p4 = scmp.eq.s32.totalorder %s1169_s14, 1 }
   0x8   : > { %s1596_s18 = scalar_select %p221_p1, %s1498_s11, %s223_s16  }
   0x9   : > { %p1598_p5 = por %p234_p2, %p233_p0  ;;  %p1602_p6 = por %p240_p4, %p239_p3 }
   0xa   : > { %p1172_p7 = scmp.ge.s32.totalorder %s1502_s12, 1  ;;  %p291_p8 = scmp.lt.s32.totalorder %s1502_s12, 3 }
   0xc   : > { %p292_p9 = pnand %p1172_p7, %p291_p8 }
   0xd   : > { %s1174_s21 = sshll.u32 (!%p292_p9), %s1581_s13, 5  ;;  %vm380_vm0 = vcmask (!%p292_p9), 64512   ;;  %v1612_v0 = vld [vmem:[%s1890_s1] sm:$0xff] (!%p292_p9)  ;;  %v1504_v2 = vmov (!%p292_p9), 0   ;;  %v369_v3 = vld [vmem:[%s1891_s2 + $0x8] sm:$0xff] (!%p292_p9)  ;;  %v672_v15 = vld [vmem:[%s1895_s6 + $0x10] sm:$0xff] (!%p292_p9) }
   0xe   : > { %295 = sbr.rel (%p292_p9) target bundleno = 1069 (0x42d), region = 56  ;;  %v368_v1 = vld [vmem:[%s1891_s2] sm:$0xff] (!%p292_p9)  ;;  %p328_p10 = scmp.lt.s32.totalorder (!%p292_p9), %s1174_s21, 63  ;;  %1262 = vmatprep.mubr.msk.f32.mxu0 (!%p292_p9), %vm380_vm0, %v1612_v0  ;;  %1374 = vset.pattern.permute.xlu0 (!%p292_p9), %v1504_v2  ;;  %vm1629_vm1 = vmpackc.low (!%p292_p9), %vm380_vm0, %vm380_vm0  ;;  %v813_v23 = vld [vmem:[%s1897_s8 + $0x10] sm:$0xff] (!%p292_p9)  ;;  %v1505_v60 = vmov (!%p292_p9), 0.0   ;;  %vm578_vm2 = vcmask (!%p292_p9), 130048  }
   0xf   : > { %372 = vperm.xlu0 (!%p292_p9), %1374, %v368_v1   ;;  %1375 = vset.pattern.permute.xlu1 (!%p292_p9), %v1504_v2  ;;  %v670_v5 = vld [vmem:[%s1895_s6] sm:$0xff] (!%p292_p9)  ;;  %v817_v31 = vld [vmem:[%s1897_s8 + $0x30] sm:$0xff] (!%p292_p9)  ;;  %v367_v59 = vld [vmem:[%s1890_s1 + $0x8] sm:$0xff] (!%p292_p9)  ;;  %vm859_vm3 = vcmask (!%p292_p9), 261120   ;;  %s324_s14 = sand.u32 (!%p292_p9), 1, %s1494_s10   ;;  %s1229_s22 = sshll.u32 (!%p292_p9), %s1581_s13, 8 }
  0x10   : > { %v811_v21 = vld [vmem:[%s1897_s8] sm:$0xff] (!%p292_p9)  ;;  %649 = vmatprep.mubr.f32.mxu1 (!%p292_p9), %v1505_v60  ;;  %v567_v62 = vld [vmem:[%s1893_s4 + $0x8] sm:$0xff] (!%p292_p9)  ;;  %v814_v2 = vld [vmem:[%s1897_s8 + $0x18] sm:$0xff] (!%p292_p9)  ;;  %s1173_s17 = sshll.u32 (!%p292_p9), %s324_s14, 7  ;;  %s1840_s25 = scalar_lea.hbm (!%p292_p9), %s1898_s9, %s1229_s22 }
  0x11   : > { %v815_v29 = vld [vmem:[%s1897_s8 + $0x20] sm:$0xff] (!%p292_p9)  ;;  %v671_v63 = vld [vmem:[%s1895_s6 + $0x8] sm:$0xff] (!%p292_p9)  ;;  %v818_v4 = vld [vmem:[%s1897_s8 + $0x38] sm:$0xff] (!%p292_p9)  ;;  %s1848_s26 = scalar_lea.sflag (!%p292_p9), [#allocation3], %s324_s14  ;;  %s1506_s27 = smov (!%p292_p9), [#allocation2]  }
  0x12   : > { %v566_v61 = vld [vmem:[%s1893_s4] sm:$0xff] (!%p292_p9)  ;;  %v812_v1 = vld [vmem:[%s1897_s8 + $0x8] sm:$0xff] (!%p292_p9) }
  0x13   : > { %377 = vperm.xlu0 (!%p292_p9), %1374, %v369_v3   ;;  %570 = vperm.xlu1 (!%p292_p9), %1375, %v566_v61   ;;  %v816_v3 = vld [vmem:[%s1897_s8 + $0x28] sm:$0xff] (!%p292_p9) }
  0x15   : > { %s1908_s21 = smov (!%p328_p10, %s1174_s21), 63 }
  0x16   : > { %s1175_s28 = sshll.u32 %s1908_s21, 3  ;;  %s1819_s21 = scalar_lea.vmem [#allocation2], %s1173_s17 }
  0x17   : > { %s1625_s16 = scalar_lea.vmem %s1889_s0, %s1175_s28  ;;  %676 = vperm.xlu0 %1374, %v670_v5   ;;  %575 = vperm.xlu1 %1375, %v567_v62   ;;  %s1107_s23 = sshll.u32 %s1819_s21, 4  ;;  %s1842_s23 = int_to_ptr.vmem [resolvable:$true] %s1107_s23 }
  0x18   : > { %v350_v6 = vld [vmem:[%s1625_s16 + $0x80] sm:$0xff]  ;;  %v351_v7 = vld [vmem:[%s1625_s16 + $0x88] sm:$0xff]  ;;  %v352_v11 = vld [vmem:[%s1625_s16 + $0x90] sm:$0xff]  ;;  %s1440_s13 = scalar_lea.vmem %s1842_s23, 2048  ;;  %s1444_s28 = sshll.u32 %s1506_s27, 4  ;;  %s1445_s28 = int_to_ptr.vmem [resolvable:$false] %s1444_s28 }
  0x19   : > { %v334_v8 = vld [vmem:[%s1625_s16] sm:$0xff]  ;;  %v1266_v9 = vpack.c.bf16 %v351_v7, %v350_v6  ;;  %v335_v10 = vld [vmem:[%s1625_s16 + $0x8] sm:$0xff]  ;;  %v353_v12 = vld [vmem:[%s1625_s16 + $0x98] sm:$0xff]  ;;  %p1441_p11 = scmp.ne.s32.totalorder %s1842_s23, %s1440_s13  ;;  %s1446_s29 = scalar_lea.vmem %s1445_s28, 4096 }
  0x1a   : > { %v1269_v13 = vpack.c.bf16 %v335_v10, %v334_v8  ;;  %v1272_v14 = vpack.c.bf16 %v353_v12, %v352_v11  ;;  %v336_v16 = vld [vmem:[%s1625_s16 + $0x10] sm:$0xff]  ;;  %v337_v17 = vld [vmem:[%s1625_s16 + $0x18] sm:$0xff]  ;;  %v354_v18 = vld [vmem:[%s1625_s16 + $0xa0] sm:$0xff]  ;;  %p1447_p0 = scmp.lt.s32.totalorder %s1842_s23, %s1445_s28  ;;  %p1448_p1 = scmp.lt.s32.totalorder %s1446_s29, %s1440_s13 }
  0x1b   : > { %1268 = vmatprep.subr.msk.bf16.mxu0 %vm1629_vm1, %v1266_v9  ;;  %v355_v19 = vld [vmem:[%s1625_s16 + $0xa8] sm:$0xff]  ;;  %686 = vperm.xlu0 %1374, %v672_v15   ;;  %v1275_v20 = vpack.c.bf16 %v337_v17, %v336_v16  ;;  %v338_v24 = vld [vmem:[%s1625_s16 + $0x20] sm:$0xff]  ;;  %v356_v26 = vld [vmem:[%s1625_s16 + $0xb0] sm:$0xff]  ;;  %p1442_p12 = pnand %p1441_p11, %p1598_p5 }
  0x1c   : > { %1271 = vmatpush3.bf16.xpose.msk.msra.mxu0 %vm1629_vm1, %v1269_v13  ;;  %v1278_v22 = vpack.c.bf16 %v355_v19, %v354_v18  ;;  %v339_v25 = vld [vmem:[%s1625_s16 + $0x28] sm:$0xff]  ;;  %v357_v27 = vld [vmem:[%s1625_s16 + $0xb8] sm:$0xff]  ;;  %v340_v32 = vld [vmem:[%s1625_s16 + $0x30] sm:$0xff]  ;;  %681 = vperm.xlu1 %1375, %v671_v63   ;;  %p1449_p2 = por %p1448_p1, %p1447_p0 }
  0x1d   : > { %1274 = vmatprep.subr.msk.bf16.mxu0 %vm1629_vm1, %v1272_v14  ;;  %v1281_v28 = vpack.c.bf16 %v339_v25, %v338_v24  ;;  %v1284_v30 = vpack.c.bf16 %v357_v27, %v356_v26  ;;  %v341_v33 = vld [vmem:[%s1625_s16 + $0x38] sm:$0xff]  ;;  %v358_v34 = vld [vmem:[%s1625_s16 + $0xc0] sm:$0xff]  ;;  %v359_v35 = vld [vmem:[%s1625_s16 + $0xc8] sm:$0xff]  ;;  %p1443_p13 = pneg %p1442_p12 }
  0x1e   : > { %v1287_v36 = vpack.c.bf16 %v341_v33, %v340_v32  ;;  %v1290_v37 = vpack.c.bf16 %v359_v35, %v358_v34  ;;  %v342_v38 = vld [vmem:[%s1625_s16 + $0x40] sm:$0xff]  ;;  %v343_v39 = vld [vmem:[%s1625_s16 + $0x48] sm:$0xff]  ;;  %v360_v40 = vld [vmem:[%s1625_s16 + $0xd0] sm:$0xff] }
  0x1f   : > { %821 = vperm.xlu0 %1374, %v811_v21   ;;  %v361_v41 = vld [vmem:[%s1625_s16 + $0xd8] sm:$0xff]  ;;  %v1293_v42 = vpack.c.bf16 %v343_v39, %v342_v38  ;;  %v344_v44 = vld [vmem:[%s1625_s16 + $0x50] sm:$0xff]  ;;  %v362_v46 = vld [vmem:[%s1625_s16 + $0xe0] sm:$0xff]  ;;  %p1450_p3 = pnand %p1449_p2, %p1443_p13 }
  0x20   : > { %v1296_v43 = vpack.c.bf16 %v361_v41, %v360_v40  ;;  %v345_v45 = vld [vmem:[%s1625_s16 + $0x58] sm:$0xff]  ;;  %v363_v47 = vld [vmem:[%s1625_s16 + $0xe8] sm:$0xff]  ;;  %v346_v50 = vld [vmem:[%s1625_s16 + $0x60] sm:$0xff] }
  0x21   : > { %v1299_v48 = vpack.c.bf16 %v345_v45, %v344_v44  ;;  %v1302_v49 = vpack.c.bf16 %v363_v47, %v362_v46  ;;  %v347_v51 = vld [vmem:[%s1625_s16 + $0x68] sm:$0xff]  ;;  %v364_v52 = vld [vmem:[%s1625_s16 + $0xf0] sm:$0xff]  ;;  %v365_v53 = vld [vmem:[%s1625_s16 + $0xf8] sm:$0xff] }
  0x22   : > { %v1305_v54 = vpack.c.bf16 %v347_v51, %v346_v50  ;;  %v1308_v55 = vpack.c.bf16 %v365_v53, %v364_v52  ;;  %v348_v56 = vld [vmem:[%s1625_s16 + $0x70] sm:$0xff]  ;;  %v349_v57 = vld [vmem:[%s1625_s16 + $0x78] sm:$0xff]  ;;  %v564_v21 = vld [vmem:[%s1892_s3] sm:$0xff] }
  0x23   : > { %831 = vperm.xlu0 %1374, %v813_v23   ;;  %v1311_v58 = vpack.c.bf16 %v349_v57, %v348_v56  ;;  %v666_v39 = vld [vmem:[%s1894_s5] sm:$0xff]  ;;  %v667_v40 = vld [vmem:[%s1894_s5 + $0x8] sm:$0xff]  ;;  %v668_v41 = vld [vmem:[%s1894_s5 + $0x10] sm:$0xff] }
  0x24   : > { %1277 = vmatpush3.bf16.xpose.msk.msra.mxu0 %vm1629_vm1, %v1275_v20 }
  0x25   : > { %1280 = vmatprep.subr.msk.bf16.mxu0 %vm1629_vm1, %v1278_v22  ;;  %v565_v22 = vld [vmem:[%s1892_s3 + $0x8] sm:$0xff] }
  0x27   : > { %841 = vperm.xlu0 %1374, %v815_v29  }
  0x2b   : > { %851 = vperm.xlu0 %1374, %v817_v31  }
  0x2c   : > { %1283 = vmatpush3.bf16.xpose.msk.msra.mxu0 %vm1629_vm1, %v1281_v28 }
  0x2d   : > { %1286 = vmatprep.subr.msk.bf16.mxu0 %vm1629_vm1, %v1284_v30 }
  0x34   : > { %1289 = vmatpush3.bf16.xpose.msk.msra.mxu0 %vm1629_vm1, %v1287_v36 }
  0x35   : > { %1292 = vmatprep.subr.msk.bf16.mxu0 %vm1629_vm1, %v1290_v37 }
  0x3c   : > { %1295 = vmatpush3.bf16.xpose.msk.msra.mxu0 %vm1629_vm1, %v1293_v42  ;;  %v669_v42 = vld [vmem:[%s1894_s5 + $0x18] sm:$0xff] }
  0x3d   : > { %1298 = vmatprep.subr.msk.bf16.mxu0 %vm1629_vm1, %v1296_v43 }
  0x44   : > { %1301 = vmatpush3.bf16.xpose.msk.msra.mxu0 %vm1629_vm1, %v1299_v48 }
  0x45   : > { %1304 = vmatprep.subr.msk.bf16.mxu0 %vm1629_vm1, %v1302_v49 }
  0x4c   : > { %1307 = vmatpush3.bf16.xpose.msk.msra.mxu0 %vm1629_vm1, %v1305_v54 }
  0x4d   : > { %1310 = vmatprep.subr.msk.bf16.mxu0 %vm1629_vm1, %v1308_v55 }
  0x54   : > { %1313 = vmatpush3.bf16.xpose.msk.msra.mxu0 %vm1629_vm1, %v1311_v58 }
  0x5b   : > { %1263 = vmatmul.mubr.msk.f32.vlgmr.msra.gmra.mrb[0].mxu0 %vm380_vm0, %v1612_v0  ;;  %v673_v0 = vld [vmem:[%s1895_s6 + $0x18] sm:$0xff] }
  0x5c   : > { %1264 = vmatprep.mubr.msk.f32.mxu0 %vm380_vm0, %v367_v59  ;;  %691 = vperm.xlu1 %1375, %v673_v0  }
  0x5f   : > { %1265 = vmatmul.mubr.msk.f32.gmra.mrb[2].mxu0 %vm380_vm0, %v367_v59 }
  0x60   : > { %826 = vperm.xlu1 %1375, %v812_v1  }
  0x64   : > { %836 = vperm.xlu1 %1375, %v814_v2  }
  0x68   : > { %846 = vperm.xlu1 %1375, %v816_v3  }
  0x6c   : > { %856 = vperm.xlu1 %1375, %v818_v4  }
  0x8e   : > { %v373_v5 = vpop.permute.xlu0 %372 }
  0x92   : > { %v378_v9 = vpop.permute.xlu0 %377  ;;  %v571_v23 = vpop.permute.xlu1 %570 }
  0x96   : > { %v576_v27 = vpop.permute.xlu1 %575  ;;  %v677_v45 = vpop.permute.xlu0 %676 }
  0x9a   : > { %v687_v61 = vpop.permute.xlu0 %686 }
  0x9b   : > { %v682_v47 = vpop.permute.xlu1 %681 }
  0xdb   : > { %v692_v0 = vpop.permute.xlu1 %691 }
 0x12e   : > { %v549_v6 = vpop.f32.mrb[0].mxu0 }
 0x12f   : > { %v551_v7 = vpop.f32.mrb[1].mxu0  ;;  %v550_v8 = vadd.f32 %v549_v6, %v373_v5 }
 0x130   : > { %v552_v10 = vadd.f32 %v551_v7, %v373_v5 }
 0x131   : > { %v560_v15 = vmax.f32 %v550_v8, 0.0 }
 0x132   : > { %v555_v11 = vpop.f32.mrb[2].mxu0  ;;  %v561_v17 = vmax.f32 %v552_v10, 0.0 }
 0x133   : > { %v556_v12 = vadd.f32 %v555_v11, %v378_v9  ;;  %v557_v13 = vpop.f32.mrb[3].mxu0 }
 0x134   : > { %v558_v14 = vadd.f32 %v557_v13, %v378_v9  ;;  %v804_v13 = vld [vmem:[%s1896_s7 + $0x8] sm:$0xff] }
 0x135   : > { %v562_v16 = vmax.f32 %v556_v12, 0.0  ;;  %v803_v12 = vld [vmem:[%s1896_s7] sm:$0xff] }
 0x136   : > { %v563_v18 = vmax.f32 %v558_v14, 0.0  ;;  %v805_v14 = vld [vmem:[%s1896_s7 + $0x10] sm:$0xff] }
 0x137   : > { %v1316_v19 = vpack.c.bf16 %v562_v16, %v560_v15  ;;  %v806_v15 = vld [vmem:[%s1896_s7 + $0x18] sm:$0xff]  ;;  %v807_v16 = vld [vmem:[%s1896_s7 + $0x20] sm:$0xff] }
 0x138   : > { %v1314_v20 = vpack.c.bf16 %v563_v18, %v561_v17  ;;  %v808_v17 = vld [vmem:[%s1896_s7 + $0x28] sm:$0xff]  ;;  %v809_v18 = vld [vmem:[%s1896_s7 + $0x30] sm:$0xff] }
 0x13a   : > { %1315 = vmatprep.subr.bf16.mxu1 %v1314_v20  ;;  %v822_v20 = vpop.permute.xlu0 %821 }
 0x13b   : > { %1317 = vmatpush1.bf16.msra.mxu1 %v1316_v19  ;;  %v810_v19 = vld [vmem:[%s1896_s7 + $0x38] sm:$0xff] }
 0x13e   : > { %1210 = vmatmul.mubr.msk.f32.vlgmr.msra.gmra.mrb[0].mxu1 %vm578_vm2, %v564_v21 }
 0x13f   : > { %655 = vmatprep.mubr.f32.mxu1 %v1505_v60 }
 0x142   : > { %1211 = vmatmul.mubr.msk.f32.gmra.mrb[2].mxu1 %vm578_vm2, %v565_v22 }
 0x143   : > { %770 = vmatprep.mubr.f32.mxu1 %v1505_v60 }
 0x211   : > { %v651_v24 = vpop.f32.mrb[0].mxu1 }
 0x212   : > { %v653_v25 = vpop.f32.mrb[1].mxu1  ;;  %v652_v26 = vadd.f32 %v651_v24, %v571_v23 }
 0x213   : > { %v654_v28 = vadd.f32 %v653_v25, %v571_v23 }
 0x214   : > { %v662_v33 = vmax.f32 %v652_v26, 0.0  ;;  %v827_v26 = vpop.permute.xlu1 %826 }
 0x215   : > { %v657_v29 = vpop.f32.mrb[2].mxu1  ;;  %v663_v35 = vmax.f32 %v654_v28, 0.0 }
 0x216   : > { %v658_v30 = vadd.f32 %v657_v29, %v576_v27  ;;  %v659_v31 = vpop.f32.mrb[3].mxu1 }
 0x217   : > { %v660_v32 = vadd.f32 %v659_v31, %v576_v27 }
 0x218   : > { %v664_v34 = vmax.f32 %v658_v30, 0.0 }
 0x219   : > { %v665_v36 = vmax.f32 %v660_v32, 0.0 }
 0x21a   : > { %v1320_v37 = vpack.c.bf16 %v664_v34, %v662_v33  ;;  %v832_v34 = vpop.permute.xlu0 %831 }
 0x21b   : > { %v1318_v38 = vpack.c.bf16 %v665_v36, %v663_v35 }
 0x21d   : > { %1319 = vmatprep.subr.bf16.mxu1 %v1318_v38 }
 0x21e   : > { %1321 = vmatpush1.bf16.msra.mxu1 %v1320_v37 }
 0x221   : > { %1212 = vmatmul.mubr.msk.f32.vlgmr.msra.gmra.mrb[4].mxu1 %vm578_vm2, %v666_v39 }
 0x222   : > { %776 = vmatprep.mubr.f32.mxu1 %v1505_v60 }
 0x225   : > { %1213 = vmatmul.mubr.msk.f32.gmra.mrb[6].mxu1 %vm578_vm2, %v667_v40 }
 0x226   : > { %782 = vmatprep.mubr.f32.mxu1 %v1505_v60 }
 0x229   : > { %1214 = vmatmul.mubr.msk.f32.gmra.mrb[8].mxu1 %vm578_vm2, %v668_v41 }
 0x22a   : > { %788 = vmatprep.mubr.f32.mxu1 %v1505_v60 }
 0x22d   : > { %1215 = vmatmul.mubr.msk.f32.gmra.mrb[10].mxu1 %vm578_vm2, %v669_v42 }
 0x22e   : > { %948 = vmatprep.mubr.f32.mxu1 %v1505_v60 }
 0x2f4   : > { %v772_v43 = vpop.f32.mrb[4].mxu1 }
 0x2f5   : > { %v774_v44 = vpop.f32.mrb[5].mxu1  ;;  %v773_v46 = vadd.f32 %v772_v43, %v677_v45  ;;  %v837_v43 = vpop.permute.xlu1 %836 }
 0x2f6   : > { %v775_v48 = vadd.f32 %v774_v44, %v677_v45 }
 0x2f7   : > { %v795_v53 = vmax.f32 %v773_v46, 0.0 }
 0x2f8   : > { %v778_v49 = vpop.f32.mrb[6].mxu1  ;;  %v796_v55 = vmax.f32 %v775_v48, 0.0 }
 0x2f9   : > { %v779_v50 = vadd.f32 %v778_v49, %v682_v47  ;;  %v780_v51 = vpop.f32.mrb[7].mxu1 }
 0x2fa   : > { %v781_v52 = vadd.f32 %v780_v51, %v682_v47 }
 0x2fb   : > { %v797_v54 = vmax.f32 %v779_v50, 0.0 }
 0x2fc   : > { %v798_v56 = vmax.f32 %v781_v52, 0.0  ;;  %v784_v57 = vpop.f32.mrb[8].mxu1  ;;  %v842_v52 = vpop.permute.xlu0 %841 }
 0x2fd   : > { %v1324_v58 = vpack.c.bf16 %v797_v54, %v795_v53  ;;  %v786_v59 = vpop.f32.mrb[9].mxu1  ;;  %v785_v63 = vadd.f32 %v784_v57, %v687_v61 }
 0x2fe   : > { %v1322_v62 = vpack.c.bf16 %v798_v56, %v796_v55  ;;  %v787_v1 = vadd.f32 %v786_v59, %v687_v61 }
 0x2ff   : > { %v799_v6 = vmax.f32 %v785_v63, 0.0 }
 0x300   : > { %v790_v2 = vpop.f32.mrb[10].mxu1  ;;  %1323 = vmatprep.subr.bf16.mxu1 %v1322_v62  ;;  %v800_v8 = vmax.f32 %v787_v1, 0.0 }
 0x301   : > { %v791_v3 = vadd.f32 %v790_v2, %v692_v0  ;;  %v792_v4 = vpop.f32.mrb[11].mxu1  ;;  %1325 = vmatpush1.bf16.msra.mxu1 %v1324_v58  ;;  %v847_v2 = vpop.permute.xlu1 %846 }
 0x302   : > { %v793_v5 = vadd.f32 %v792_v4, %v692_v0 }
 0x303   : > { %v801_v7 = vmax.f32 %v791_v3, 0.0 }
 0x304   : > { %v802_v9 = vmax.f32 %v793_v5, 0.0 }
 0x305   : > { %v1328_v10 = vpack.c.bf16 %v801_v7, %v799_v6 }
 0x306   : > { %v1326_v11 = vpack.c.bf16 %v802_v9, %v800_v8 }
 0x308   : > { %1327 = vmatprep.subr.bf16.mxu1 %v1326_v11 }
 0x309   : > { %1329 = vmatpush1.bf16.msra.mxu1 %v1328_v10 }
 0x30c   : > { %1216 = vmatmul.mubr.msk.f32.vlgmr.msra.gmra.mrb[12].mxu1 %vm859_vm3, %v803_v12 }
 0x30d   : > { %954 = vmatprep.mubr.f32.mxu1 %v1505_v60 }
 0x310   : > { %1217 = vmatmul.mubr.msk.f32.gmra.mrb[14].mxu1 %vm859_vm3, %v804_v13 }
 0x311   : > { %960 = vmatprep.mubr.f32.mxu1 %v1505_v60 }
 0x314   : > { %1218 = vmatmul.mubr.msk.f32.gmra.mrb[16].mxu1 %vm859_vm3, %v805_v14 }
 0x315   : > { %966 = vmatprep.mubr.f32.mxu1 %v1505_v60 }
 0x318   : > { %1219 = vmatmul.mubr.msk.f32.gmra.mrb[18].mxu1 %vm859_vm3, %v806_v15  ;;  %v852_v15 = vpop.permute.xlu0 %851 }
 0x319   : > { %972 = vmatprep.mubr.f32.mxu1 %v1505_v60 }
 0x31c   : > { %1220 = vmatmul.mubr.msk.f32.gmra.mrb[20].mxu1 %vm859_vm3, %v807_v16 }
 0x31d   : > { %978 = vmatprep.mubr.f32.mxu1 %v1505_v60 }
 0x320   : > { %1221 = vmatmul.mubr.msk.f32.gmra.mrb[22].mxu1 %vm859_vm3, %v808_v17 }
 0x321   : > { %984 = vmatprep.mubr.f32.mxu1 %v1505_v60 }
 0x324   : > { %1222 = vmatmul.mubr.msk.f32.gmra.mrb[24].mxu1 %vm859_vm3, %v809_v18 }
 0x325   : > { %990 = vmatprep.mubr.f32.mxu1 %v1505_v60 }
 0x328   : > { %1223 = vmatmul.mubr.msk.f32.gmra.mrb[26].mxu1 %vm859_vm3, %v810_v19 }
 0x3df   : > { %v950_v21 = vpop.f32.mrb[12].mxu1 }
 0x3e0   : > { %v951_v22 = vadd.f32 %v950_v21, %v822_v20  ;;  %v952_v23 = vpop.f32.mrb[13].mxu1 }
 0x3e1   : > { %v953_v24 = vadd.f32 %v952_v23, %v822_v20 }
 0x3e2   : > { %v997_v25 = vsub.f32 0.0, %v951_v22 }
 0x3e3   : > { %v998_v27 = vsub.f32 0.0, %v953_v24  ;;  %v956_v28 = vpop.f32.mrb[14].mxu1 }
 0x3e4   : > { %v1013_v29 = vmul.f32 1.442695, %v997_v25  ;;  %v957_v30 = vadd.f32 %v956_v28, %v827_v26  ;;  %v958_v31 = vpop.f32.mrb[15].mxu1  ;;  %v857_v28 = vpop.permute.xlu1 %856 }
 0x3e5   : > { %v1015_v32 = vmul.f32 1.442695, %v998_v27  ;;  %v959_v60 = vadd.f32 %v958_v31, %v827_v26 }
 0x3e6   : > { %1376 = vpow2.f32 %v1013_v29  ;;  %v999_v33 = vsub.f32 0.0, %v957_v30 }
 0x3e7   : > { %1378 = vpow2.f32 %v1015_v32  ;;  %v1000_v35 = vsub.f32 0.0, %v959_v60  ;;  %v962_v36 = vpop.f32.mrb[16].mxu1 }
 0x3e8   : > { %v1017_v37 = vmul.f32 1.442695, %v999_v33  ;;  %v963_v38 = vadd.f32 %v962_v36, %v832_v34  ;;  %v964_v39 = vpop.f32.mrb[17].mxu1 }
 0x3e9   : > { %v1019_v40 = vmul.f32 1.442695, %v1000_v35  ;;  %v965_v41 = vadd.f32 %v964_v39, %v832_v34 }
 0x3ea   : > { %1380 = vpow2.f32 %v1017_v37  ;;  %v1001_v42 = vsub.f32 0.0, %v963_v38 }
 0x3eb   : > { %1382 = vpow2.f32 %v1019_v40  ;;  %v1002_v44 = vsub.f32 0.0, %v965_v41  ;;  %v968_v45 = vpop.f32.mrb[18].mxu1 }
 0x3ec   : > { %v1021_v46 = vmul.f32 1.442695, %v1001_v42  ;;  %v969_v47 = vadd.f32 %v968_v45, %v837_v43  ;;  %v970_v48 = vpop.f32.mrb[19].mxu1 }
 0x3ed   : > { %v1023_v49 = vmul.f32 1.442695, %v1002_v44  ;;  %v971_v50 = vadd.f32 %v970_v48, %v837_v43 }
 0x3ee   : > { %1384 = vpow2.f32 %v1021_v46  ;;  %v1003_v51 = vsub.f32 0.0, %v969_v47 }
 0x3ef   : > { %1386 = vpow2.f32 %v1023_v49  ;;  %v1004_v53 = vsub.f32 0.0, %v971_v50  ;;  %v974_v54 = vpop.f32.mrb[20].mxu1 }
 0x3f0   : > { %v1377_v55 = vpop.eup %1376  ;;  %v1025_v56 = vmul.f32 1.442695, %v1003_v51  ;;  %v975_v57 = vadd.f32 %v974_v54, %v842_v52  ;;  %v976_v58 = vpop.f32.mrb[21].mxu1 }
 0x3f1   : > { %v1379_v59 = vpop.eup %1378  ;;  %v1045_v61 = vadd.f32 1.0, %v1377_v55  ;;  %v1027_v62 = vmul.f32 1.442695, %v1004_v53  ;;  %v977_v63 = vadd.f32 %v976_v58, %v842_v52 }
 0x3f2   : > { %v1046_v0 = vadd.f32 1.0, %v1379_v59  ;;  %1388 = vpow2.f32 %v1025_v56  ;;  %v1005_v1 = vsub.f32 0.0, %v975_v57 }
 0x3f3   : > { %1390 = vrcp.f32 %v1045_v61  ;;  %v1006_v3 = vsub.f32 0.0, %v977_v63  ;;  %v980_v4 = vpop.f32.mrb[22].mxu1 }
 0x3f4   : > { %v1381_v5 = vpop.eup %1380  ;;  %1392 = vrcp.f32 %v1046_v0  ;;  %v1029_v6 = vmul.f32 1.442695, %v1005_v1  ;;  %v981_v7 = vadd.f32 %v980_v4, %v847_v2  ;;  %v982_v8 = vpop.f32.mrb[23].mxu1 }
 0x3f5   : > { %v1383_v9 = vpop.eup %1382  ;;  %v1047_v10 = vadd.f32 1.0, %v1381_v5  ;;  %1394 = vpow2.f32 %v1027_v62  ;;  %v1031_v11 = vmul.f32 1.442695, %v1006_v3  ;;  %v983_v12 = vadd.f32 %v982_v8, %v847_v2 }
 0x3f6   : > { %v1048_v13 = vadd.f32 1.0, %v1383_v9  ;;  %1396 = vpow2.f32 %v1029_v6  ;;  %v1007_v14 = vsub.f32 0.0, %v981_v7 }
 0x3f7   : > { %1398 = vrcp.f32 %v1047_v10  ;;  %v1008_v16 = vsub.f32 0.0, %v983_v12  ;;  %v986_v17 = vpop.f32.mrb[24].mxu1 }
 0x3f8   : > { %v1385_v18 = vpop.eup %1384  ;;  %1400 = vrcp.f32 %v1048_v13  ;;  %v1033_v19 = vmul.f32 1.442695, %v1007_v14  ;;  %v987_v20 = vadd.f32 %v986_v17, %v852_v15  ;;  %v988_v21 = vpop.f32.mrb[25].mxu1 }
 0x3f9   : > { %v1387_v22 = vpop.eup %1386  ;;  %v1049_v23 = vadd.f32 1.0, %v1385_v18  ;;  %1402 = vpow2.f32 %v1031_v11  ;;  %v1035_v24 = vmul.f32 1.442695, %v1008_v16  ;;  %v989_v25 = vadd.f32 %v988_v21, %v852_v15 }
 0x3fa   : > { %v1050_v26 = vadd.f32 1.0, %v1387_v22  ;;  %1404 = vpow2.f32 %v1033_v19  ;;  %v1009_v27 = vsub.f32 0.0, %v987_v20 }
 0x3fb   : > { %1406 = vrcp.f32 %v1049_v23  ;;  %v1010_v29 = vsub.f32 0.0, %v989_v25  ;;  %v992_v30 = vpop.f32.mrb[26].mxu1 }
 0x3fc   : > { %v1389_v31 = vpop.eup %1388  ;;  %1408 = vrcp.f32 %v1050_v26  ;;  %v1037_v32 = vmul.f32 1.442695, %v1009_v27  ;;  %v993_v60 = vadd.f32 %v992_v30, %v857_v28  ;;  %v994_v33 = vpop.f32.mrb[27].mxu1 }
 0x3fd   : > { %v1391_v34 = vpop.eup %1390  ;;  %v1051_v35 = vadd.f32 1.0, %v1389_v31  ;;  %1410 = vpow2.f32 %v1035_v24  ;;  %v1039_v36 = vmul.f32 1.442695, %v1010_v29  ;;  %v995_v37 = vadd.f32 %v994_v33, %v857_v28 }
 0x3fe   : > { %v1393_v38 = vpop.eup %1392  ;;  %1077 = vst [vmem:[%s1819_s21] sm:$0xff] %v1391_v34  ;;  %1412 = vpow2.f32 %v1037_v32  ;;  %v1011_v39 = vsub.f32 0.0, %v993_v60 }
 0x3ff   : > { %v1395_v40 = vpop.eup %1394  ;;  %1078 = vst [vmem:[%s1819_s21 + $0x8] sm:$0xff] %v1393_v38  ;;  %1414 = vrcp.f32 %v1051_v35  ;;  %v1012_v41 = vsub.f32 0.0, %v995_v37 }
 0x400   : > { %v1397_v42 = vpop.eup %1396  ;;  %v1052_v43 = vadd.f32 1.0, %v1395_v40  ;;  %1416 = vpow2.f32 %v1039_v36  ;;  %v1041_v44 = vmul.f32 1.442695, %v1011_v39 }
 0x401   : > { %v1399_v45 = vpop.eup %1398  ;;  %v1053_v46 = vadd.f32 1.0, %v1397_v42  ;;  %v1043_v47 = vmul.f32 1.442695, %v1012_v41 }
 0x402   : > { %v1401_v48 = vpop.eup %1400  ;;  %1079 = vst [vmem:[%s1819_s21 + $0x10] sm:$0xff] %v1399_v45  ;;  %1418 = vrcp.f32 %v1052_v43 }
 0x403   : > { %v1403_v49 = vpop.eup %1402  ;;  %1080 = vst [vmem:[%s1819_s21 + $0x18] sm:$0xff] %v1401_v48  ;;  %1420 = vrcp.f32 %v1053_v46 }
 0x404   : > { %v1405_v50 = vpop.eup %1404  ;;  %v1054_v51 = vadd.f32 1.0, %v1403_v49  ;;  %1422 = vpow2.f32 %v1041_v44 }
 0x405   : > { %v1407_v52 = vpop.eup %1406  ;;  %v1055_v53 = vadd.f32 1.0, %v1405_v50  ;;  %1424 = vpow2.f32 %v1043_v47 }
 0x406   : > { %v1409_v54 = vpop.eup %1408  ;;  %1081 = vst [vmem:[%s1819_s21 + $0x20] sm:$0xff] %v1407_v52  ;;  %1426 = vrcp.f32 %v1054_v51 }
 0x407   : > { %v1411_v55 = vpop.eup %1410  ;;  %1082 = vst [vmem:[%s1819_s21 + $0x28] sm:$0xff] %v1409_v54  ;;  %1428 = vrcp.f32 %v1055_v53 }
 0x408   : > { %v1413_v56 = vpop.eup %1412  ;;  %v1056_v57 = vadd.f32 1.0, %v1411_v55 }
 0x409   : > { %v1415_v58 = vpop.eup %1414  ;;  %v1057_v59 = vadd.f32 1.0, %v1413_v56 }
 0x40a   : > { %v1417_v61 = vpop.eup %1416  ;;  %1083 = vst [vmem:[%s1819_s21 + $0x30] sm:$0xff] %v1415_v58  ;;  %1430 = vrcp.f32 %v1056_v57 }
 0x40b   : > { %1432 = vrcp.f32 %v1057_v59  ;;  %v1058_v62 = vadd.f32 1.0, %v1417_v61 }
 0x40c   : > { %v1419_v63 = vpop.eup %1418 }
 0x40d   : > { %v1421_v0 = vpop.eup %1420  ;;  %1084 = vst [vmem:[%s1819_s21 + $0x38] sm:$0xff] %v1419_v63  ;;  %1434 = vrcp.f32 %v1058_v62 }
 0x40e   : > { %v1423_v1 = vpop.eup %1422  ;;  %1085 = vst [vmem:[%s1819_s21 + $0x40] sm:$0xff] %v1421_v0 }
 0x40f   : > { %v1425_v2 = vpop.eup %1424  ;;  %v1059_v3 = vadd.f32 1.0, %v1423_v1 }
 0x410   : > { %v1427_v4 = vpop.eup %1426  ;;  %v1060_v5 = vadd.f32 1.0, %v1425_v2 }
 0x411   : > { %v1429_v6 = vpop.eup %1428  ;;  %1086 = vst [vmem:[%s1819_s21 + $0x48] sm:$0xff] %v1427_v4  ;;  %1436 = vrcp.f32 %v1059_v3 }
 0x412   : > { %1087 = vst [vmem:[%s1819_s21 + $0x50] sm:$0xff] %v1429_v6  ;;  %1438 = vrcp.f32 %v1060_v5 }
 0x414   : > { %v1431_v7 = vpop.eup %1430 }
 0x415   : > { %v1433_v8 = vpop.eup %1432  ;;  %1088 = vst [vmem:[%s1819_s21 + $0x58] sm:$0xff] %v1431_v7 }
 0x416   : > { %1089 = vst [vmem:[%s1819_s21 + $0x60] sm:$0xff] %v1433_v8 }
 0x417   : > { %v1435_v9 = vpop.eup %1434 }
 0x418   : > { %1090 = vst [vmem:[%s1819_s21 + $0x68] sm:$0xff] %v1435_v9 }
 0x41b   : > { %v1437_v10 = vpop.eup %1436 }
 0x41c   : > { %v1439_v11 = vpop.eup %1438  ;;  %1091 = vst [vmem:[%s1819_s21 + $0x70] sm:$0xff] %v1437_v10 }
 0x41d   : > { %1092 = vst [vmem:[%s1819_s21 + $0x78] sm:$0xff] %v1439_v11 }
 0x41e   : > { %1453 = shalt.err (!%p1450_p3)
}
 0x41f   : > { %s1454_s14 = scalar_lea.hbm %s1840_s25, 2048  ;;  %s1458_s22 = scalar_lea.hbm %s1898_s9, 4096 }
 0x420   : > { %p1455_p4 = scmp.ne.s32.totalorder %s1840_s25, %s1454_s14  ;;  %p1459_p9 = scmp.lt.u32.totalorder %s1840_s25, %s1898_s9 }
 0x421   : > { %p1460_p10 = scmp.lt.u32.totalorder %s1458_s22, %s1454_s14  ;;  %p1462_p12 = scmp.lt.u32.totalorder %s1454_s14, %s1840_s25 }
 0x422   : > { %p1456_p7 = pnand %p1455_p4, %p1598_p5 }
 0x423   : > { %p1461_p11 = por %p1460_p10, %p1459_p9 }
 0x424   : > { %p1457_p8 = pneg %p1456_p7 }
 0x425   : > { %p1463_p13 = por %p1462_p12, %p1461_p11 }
 0x427   : > { %p1464_p0 = pnand %p1463_p13, %p1457_p8 }
 0x429   : > { %1467 = shalt.err (!%p1464_p0)
}
 0x42a   : > { %s1507_s13 = smov 256   ;;  %s1508_s27 = smov 512  }
 0x42b   : > { %s1509_s28 = smov 16  }
 0x42c   : > { %1330 = dma.vmem_to_hbm [thread:$0]  (%p1598_p5), %s1842_s23, 2048, %s1840_s25, %s1848_s26, %s1507_s13, %s1508_s27, %s1509_s28  }
 0x42d PF: > { %p1336_p1 = scmp.ge.s32.totalorder %s1502_s12, 2  ;;  %s1122_s29 = sand.u32 1, %s1490_s30  }
 0x42e   : > { %s1123_s14 = scalar_lea.sflag [#allocation3], %s1122_s29 }
 0x42f   : > { %p1333_p2 = pnand %p1336_p1, %p1602_p6 }
 0x431   : > { %1485 = dma.done.wait (!%p1333_p2), %s1123_s14, 2048  }
 0x432   : > { %1487 = vsyncadd (!%p1333_p2), %s1123_s14, 4294965248  ;;  %p19_p3 = scmp.ge.s32.totalorder %s1585_s15, 4   ;;  %s1903_s30 = smov %s1494_s10 }
 0x433   : > { %s1904_s10 = smov %s1498_s11  ;;  %s1905_s11 = smov %s1596_s18 }
 0x434   : > { %s1906_s12 = smov %s1585_s15  ;;  %21 = sbr.rel (!%p19_p3) target bundleno = 3 (0x3), region = 91 }
 0x43b   :  { %1128 = vsyncpa [#allocation3], 1 }
 0x43c   :  { %1130 = vsyncpa [#allocation3 + $0x1], 1 }

</bundles_post_ra>
